<compile_context>
chip_gen: v5e
topology: v5e:2x2
jax: 0.10.0
libtpu: 0.0.40
codegen_flags: <defaults>
</compile_context>

<pallas_src>
import jax
import jax.numpy as jnp
from jax.experimental import pallas as pl
from jax.experimental.pallas import tpu as pltpu


def _stem_conv1x1_kernel(x_ref, w_ref, o_ref):
    # x_ref: (K, TILE_HW)  bf16 -- channels-first activation tile
    # w_ref: (OC, K)       bf16 -- VMEM-resident 1x1-conv weight
    # o_ref: (OC, TILE_HW)      -- lane-dense output tile (already NC(HW))
    o_ref[...] = jnp.dot(
        w_ref[...], x_ref[...], preferred_element_type=jnp.float32
    ).astype(o_ref.dtype)


def space_to_depth_nchw(x, stride):
    """Exact replica of the module's reshape/transpose chain (NCHW in/out)."""
    B, C, H, W = x.shape
    s = stride
    Hs, Ws = H // s, W // s
    x = x.reshape(B, C, Hs, s, Ws, s)            # (B, C, Hs, s1, Ws, s2)
    x = jnp.swapaxes(x, 4, 3)                    # (B, C, Hs, Ws, s1, s2)
    x = x.reshape(B, C, 1, Hs, Ws, s * s)        # merge (s1, s2) -> s*s
    x = jnp.swapaxes(x, 2, 5)                    # (B, C, s*s, Hs, Ws, 1)
    x = x.reshape(B, C * s * s, Hs, Ws)          # channel = c*s*s + s1*s + s2
    return x


def _choose_hw_tile(hw, max_tile=512):
    """Lane-axis tile: full extent when small, else a 128-multiple <= max_tile."""
    if hw <= max_tile:
        return hw                                # full-extent block: always legal
    return max(128, (max_tile // 128) * 128)     # multiple of 128


def tresnet_stem_forward(x, conv_weight, stride, *, out_dtype=jnp.bfloat16,
                         max_tile_hw=512):
    """x: (B, C, H, W) NCHW.  conv_weight: (OC, C*stride*stride, 1, 1)."""
    B, C, H, W = x.shape
    OC = conv_weight.shape[0]
    s = stride
    Hs, Ws = H // s, W // s
    K = C * s * s
    HW = Hs * Ws

    # bf16 inputs halve the dominant HBM read; MXU accumulates in f32.
    xb = x.astype(jnp.bfloat16)
    w_mat = conv_weight.reshape(OC, K).astype(jnp.bfloat16)

    # Space-to-depth directly into the kernel's channels-first layout (B, K, HW);
    # channel ordering k = c*s*s + s1*s + s2 matches the module.  XLA fuses the
    # f32->bf16 cast into this single transpose pass.
    xk = xb.reshape(B, C, Hs, s, Ws, s)
    xk = jnp.transpose(xk, (0, 1, 3, 5, 2, 4))   # (B, C, s1, s2, Hs, Ws)
    xk = xk.reshape(B, K, HW)

    tile_hw = _choose_hw_tile(HW, max_tile_hw)
    num_hw_tiles = pl.cdiv(HW, tile_hw)          # trailing block may be partial

    out_itemsize = jnp.dtype(out_dtype).itemsize
    cost = pl.CostEstimate(
        flops=2 * B * HW * K * OC,
        transcendentals=0,
        bytes_accessed=(B * K * HW * 2                 # bf16 activations in
                        + OC * K * 2                   # bf16 weights in
                        + B * OC * HW * out_itemsize), # output
    )

    out = pl.pallas_call(
        _stem_conv1x1_kernel,
        out_shape=jax.ShapeDtypeStruct((B, OC, HW), out_dtype),
        grid_spec=pltpu.PrefetchScalarGridSpec(
            num_scalar_prefetch=0,
            grid=(B, num_hw_tiles),
            in_specs=[
                pl.BlockSpec((None, K, tile_hw), lambda b, j: (b, 0, j)),
                pl.BlockSpec((OC, K), lambda b, j: (0, 0)),   # resident weight
            ],
            out_specs=pl.BlockSpec((None, OC, tile_hw), lambda b, j: (b, 0, j)),
        ),
        compiler_params=pltpu.CompilerParams(
            dimension_semantics=("parallel", "parallel"),
            # Advisory: allow XLA to fold the cast/space-to-depth producer into
            # the activation operand; never applied to the weights.
            allow_input_fusion=[True, False],
        ),
        cost_estimate=cost,
    )(xk, w_mat)

    return out.reshape(B, OC, Hs, Ws)            # NCHW; metadata-only reshape


def _run_case(B, C, H, W, stride, out_channel, seed):
    K = C * stride * stride
    key = jax.random.PRNGKey(seed)
    kx, kw = jax.random.split(key)
    x = jax.random.normal(kx, (B, C, H, W), dtype=jnp.float32)
    # conv1x1 weight (OC, in_channel*stride*stride, 1, 1), bias=False
    conv_weight = jax.random.normal(kw, (out_channel, K, 1, 1),
                                    dtype=jnp.float32) * 0.05

    out = tresnet_stem_forward(x, conv_weight, stride)
    out = jax.block_until_ready(out)
    assert out.shape == (B, out_channel, H // stride, W // stride)

    # reference in plain JAX (module's space-to-depth + 1x1 conv), f32
    x_sd = space_to_depth_nchw(x, stride)                     # (B, K, Hs, Ws)
    ref = jnp.einsum("bkhw,ok->bohw", x_sd, conv_weight.reshape(out_channel, K))
    out_f32 = out.astype(jnp.float32)
    # bf16 inputs + bf16 output, f32 accumulation => loose-but-meaningful tol
    assert jnp.allclose(out_f32, ref, atol=2e-2, rtol=2e-2), \
        float(jnp.max(jnp.abs(out_f32 - ref)))


if __name__ == "__main__":
    # Small shapes consistent with the module defaults (stride=4, kernel_size=1):
    # K=64, HW=16 -> single full-extent lane block, grid=(2, 1).
    _run_case(B=2, C=4, H=16, W=16, stride=4, out_channel=64, seed=0)
    # Multi-tile path (ImageNet-stem-like channels): K=48, HW=1024 -> two
    # 512-lane tiles, grid=(1, 2); exercises the pipelined / multi-core path.
    _run_case(B=1, C=3, H=128, W=128, stride=4, out_channel=64, seed=1)
    print("KERNEL_OK")
</pallas_src>

<mosaic_0001>
module attributes {stable_mosaic.version = 11 : i64} {
  func.func @_stem_conv1x1_kernel(%arg0: i32, %arg1: i32, %arg2: memref<1x64x16xbf16, #tpu.memory_space<vmem>>, %arg3: memref<64x64xbf16, #tpu.memory_space<vmem>>, %arg4: memref<1x64x16xbf16, #tpu.memory_space<vmem>>) attributes {dimension_semantics = [#tpu.dimension_semantics<parallel>, #tpu.dimension_semantics<parallel>], iteration_bounds = array<i64: 2, 1>, scalar_prefetch = 0 : i64, scratch_operands = 0 : i64, tpu.core_type = #tpu.core_type<tc>, window_params = [{transform_indices = @transform_0, window_bounds = array<i64: 1, 64, 16>}, {pipeline_mode = #tpu.pipeline_mode<synchronous>, transform_indices = @transform_1, window_bounds = array<i64: 64, 64>}, {transform_indices = @transform_2, window_bounds = array<i64: 1, 64, 16>}]} {
    %c0 = arith.constant 0 : index
    %c0_0 = arith.constant 0 : index
    %0 = vector.load %arg3[%c0, %c0_0] : memref<64x64xbf16, #tpu.memory_space<vmem>>, vector<64x64xbf16>
    %c0_1 = arith.constant 0 : index
    %c0_2 = arith.constant 0 : index
    %c0_3 = arith.constant 0 : index
    %1 = vector.load %arg2[%c0_1, %c0_2, %c0_3] : memref<1x64x16xbf16, #tpu.memory_space<vmem>>, vector<1x64x16xbf16>
    %2 = vector.shape_cast %1 : vector<1x64x16xbf16> to vector<64x16xbf16>
    %cst = arith.constant dense<0.000000e+00> : vector<64x16xf32>
    %3 = tpu.matmul %0, %2, %cst {dimension_numbers = #tpu.dot_dimension_numbers<[1], [0], [0], [1], [0, 0, 1, 1], [], []>} : vector<64x64xbf16>, vector<64x16xbf16>, vector<64x16xf32> -> vector<64x16xf32>
    %4 = arith.truncf %3 : vector<64x16xf32> to vector<64x16xbf16>
    %c0_4 = arith.constant 0 : index
    %c0_5 = arith.constant 0 : index
    %c0_6 = arith.constant 0 : index
    %5 = vector.load %arg4[%c0_4, %c0_5, %c0_6] : memref<1x64x16xbf16, #tpu.memory_space<vmem>>, vector<1x64x16xbf16>
    %6 = vector.shape_cast %5 : vector<1x64x16xbf16> to vector<64x16xbf16>
    %7 = vector.shape_cast %4 : vector<64x16xbf16> to vector<1x64x16xbf16>
    tpu.vector_store %arg4[%c0_4, %c0_5, %c0_6], %7 {strides = array<i32>} : memref<1x64x16xbf16, #tpu.memory_space<vmem>>, vector<1x64x16xbf16>,
    return
  }
  func.func @transform_0(%arg0: i32, %arg1: i32) -> (i32, i32, i32) {
    %c0_i32 = arith.constant 0 : i32
    %c0_i32_0 = arith.constant 0 : i32
    return %arg0, %c0_i32, %arg1 : i32, i32, i32
  }
  func.func @transform_1(%arg0: i32, %arg1: i32) -> (i32, i32) {
    %c0_i32 = arith.constant 0 : i32
    %c0_i32_0 = arith.constant 0 : i32
    %c0_i32_1 = arith.constant 0 : i32
    return %c0_i32, %c0_i32_0 : i32, i32
  }
  func.func @transform_2(%arg0: i32, %arg1: i32) -> (i32, i32, i32) {
    %c0_i32 = arith.constant 0 : i32
    %c0_i32_0 = arith.constant 0 : i32
    return %arg0, %c0_i32, %arg1 : i32, i32, i32
  }
}

</mosaic_0001>

<bundles_post_ra>
// kernel: tpu_custom_call.1
= control target key start
LH: loop header
LB: loop body
LE: loop exit
PB: predicated region body
PF: predicated region fallthrough
CT: control target
= control target key end

     0   :  { %s510_s9 = smov 0   ;;  %s512_s10 = smov 0   ;;  %s570_s0 = inlined_call_operand.vmem [shape: bf16[2,64,16], index: 0, kind: input, shape index: {}]   ;;  %s571_s1 = inlined_call_operand.vmem [shape: bf16[64,64], index: 1, kind: input, shape index: {}]   ;;  %s572_s2 = inlined_call_operand.vmem [shape: bf16[2,64,16], index: 2, kind: output, shape index: {}]  }
   0x1   :  { %s514_s11 = smov 0  }
   0x2 LB: > { %s24_s12 = sadd.s32 1, %s489_s10  ;;  %p382_p0 = scmp.ge.s32.totalorder %s493_s11, 1  ;;  %s493_s11 = sphi %s514_s11, %s12_s11   ;;  %s489_s10 = sphi %s512_s10, %s574_s10   ;;  %s485_s9 = sphi %s510_s9, %s573_s9  }
   0x3   : > { %p26_p1 = scmp.ge.s32.totalorder %s24_s12, 2  ;;  %p131_p2 = scmp.lt.s32.totalorder %s493_s11, 3 }
   0x5   : > { %s576_s12 = smov (%p26_p1, %s24_s12), 0  ;;  %p132_p3 = pnand %p382_p0, %p131_p2 }
   0x6   : > { %p159_p4 = scmp.lt.s32.totalorder (!%p132_p3), %s485_s9, 1 }
   0x7   : > { %135 = sbr.rel (%p132_p3) target bundleno = 176 (0xb0), region = 28 }
   0xc   : > { %s578_s9 = smov (!%p159_p4, %s485_s9), 1  ;;  %v427_v4 = vld [vmem:[%s571_s1] sm:$0xff]  ;;  %v428_v5 = vld [vmem:[%s571_s1 + $0x8] sm:$0xff]  ;;  %vm236_vm0 = vcmask 523264   ;;  %v429_v6 = vld [vmem:[%s571_s1 + $0x10] sm:$0xff]  ;;  %vm286_vm1 = vcmask 125952  }
   0xd   : > { %s425_s13 = sshll.u32 %s578_s9, 5  ;;  %v430_v7 = vld [vmem:[%s571_s1 + $0x18] sm:$0xff] }
   0xe   : > { %s166_s16 = scalar_lea.vmem %s570_s0, %s425_s13  ;;  %s174_s27 = scalar_lea.vmem %s572_s2, %s425_s13 }
   0xf   : > { %v434_v0 = vld [vmem:[%s166_s16 + $0x18] sm:$0xff]  ;;  %v433_v1 = vld [vmem:[%s166_s16 + $0x10] sm:$0xff]  ;;  %v432_v2 = vld [vmem:[%s166_s16 + $0x8] sm:$0xff] }
  0x10   : > { %253 = vmatpush.bf16.msra.mxu0 %v434_v0  ;;  %435 = vmatpush.bf16.msra.mxu1 %v434_v0  ;;  %v431_v3 = vld [vmem:[%s166_s16] sm:$0xff] }
  0x11   : > { %436 = vmatpush.bf16.msra.mxu2 %v434_v0  ;;  %437 = vmatpush.bf16.msra.mxu3 %v434_v0 }
  0x14   : > { %254 = vmatpush.bf16.msra.mxu0 %v433_v1  ;;  %438 = vmatpush.bf16.msra.mxu1 %v433_v1 }
  0x15   : > { %439 = vmatpush.bf16.msra.mxu2 %v433_v1  ;;  %440 = vmatpush.bf16.msra.mxu3 %v433_v1 }
  0x18   : > { %255 = vmatpush.bf16.msra.mxu0 %v432_v2  ;;  %441 = vmatpush.bf16.msra.mxu1 %v432_v2 }
  0x19   : > { %442 = vmatpush.bf16.msra.mxu2 %v432_v2  ;;  %443 = vmatpush.bf16.msra.mxu3 %v432_v2 }
  0x1c   : > { %256 = vmatpush.bf16.msra.mxu0 %v431_v3  ;;  %444 = vmatpush.bf16.msra.mxu1 %v431_v3 }
  0x1d   : > { %445 = vmatpush.bf16.msra.mxu2 %v431_v3  ;;  %446 = vmatpush.bf16.msra.mxu3 %v431_v3 }
  0x1f   : > { %419 = vmatmul.msk.bf16.vlgmr.msra.gmra.mxu0 %vm236_vm0, %v427_v4  ;;  %420 = vmatmul.msk.bf16.vlgmr.msra.gmra.mxu1 %vm236_vm0, %v428_v5 }
  0x20   : > { %421 = vmatmul.msk.bf16.vlgmr.msra.gmra.mxu2 %vm236_vm0, %v429_v6  ;;  %422 = vmatmul.msk.bf16.vlgmr.msra.gmra.mxu3 %vm236_vm0, %v430_v7 }
  0x9c   : > { %v258_v8 = vpop.f32.mrf.mxu0  ;;  %v263_v9 = vpop.f32.mrf.mxu1 }
  0x9d   : > { %v278_v10 = vpack.c.bf16 %v258_v8, %v258_v8  ;;  %v280_v11 = vpack.c.bf16 %v263_v9, %v263_v9 }
  0x9f   : > { %287 = vst.msk [vmem:[%s174_s27] sm:$0xf] %vm286_vm1, %v278_v10 }
  0xa0   : > { %289 = vst.msk [vmem:[%s174_s27 + $0x8] sm:$0xf] %vm286_vm1, %v280_v11 }
  0xa3   : > { %v268_v12 = vpop.f32.mrf.mxu2  ;;  %v273_v13 = vpop.f32.mrf.mxu3 }
  0xa4   : > { %v282_v14 = vpack.c.bf16 %v268_v12, %v268_v12  ;;  %v284_v15 = vpack.c.bf16 %v273_v13, %v273_v13  ;;  %v260_v16 = vpop.f32.mrf.mxu0  ;;  %v265_v17 = vpop.f32.mrf.mxu1 }
  0xa5   : > { %v279_v18 = vpack.c.bf16 %v260_v16, %v260_v16  ;;  %v281_v19 = vpack.c.bf16 %v265_v17, %v265_v17 }
  0xa6   : > { %291 = vst.msk [vmem:[%s174_s27 + $0x10] sm:$0xf] %vm286_vm1, %v282_v14 }
  0xa7   : > { %293 = vst.msk [vmem:[%s174_s27 + $0x18] sm:$0xf] %vm286_vm1, %v284_v15 }
  0xa8   : > { %288 = vst.msk [vmem:[%s174_s27 + $0x4] sm:$0xf] %vm286_vm1, %v279_v18 }
  0xa9   : > { %290 = vst.msk [vmem:[%s174_s27 + $0xc] sm:$0xf] %vm286_vm1, %v281_v19 }
  0xab   : > { %v270_v20 = vpop.f32.mrf.mxu2  ;;  %v275_v21 = vpop.f32.mrf.mxu3 }
  0xac   : > { %v283_v22 = vpack.c.bf16 %v270_v20, %v270_v20  ;;  %v285_v23 = vpack.c.bf16 %v275_v21, %v275_v21 }
  0xae   : > { %292 = vst.msk [vmem:[%s174_s27 + $0x14] sm:$0xf] %vm286_vm1, %v283_v22 }
  0xaf   : > { %294 = vst.msk [vmem:[%s174_s27 + $0x1c] sm:$0xf] %vm286_vm1, %v285_v23 }
  0xb0 PF: > { %s12_s11 = sadd.s32 1, %s493_s11   ;;  %s573_s9 = smov %s489_s10 }
  0xb1   : > { %p9_p5 = scmp.ge.s32.totalorder %s12_s11, 4   ;;  %s574_s10 = smov %s576_s12 }
  0xb3   :  { %11 = sbr.rel (!%p9_p5) target bundleno = 2 (0x2), region = 58 }

</bundles_post_ra>
